<compile_context>
chip_gen: v6e
topology: v6e:2x2x1
jax: 0.10.0
libtpu: 0.0.40
codegen_flags: <defaults>
</compile_context>

<pallas_src>
import jax
import jax.numpy as jnp
from jax.experimental import pallas as pl
from jax.experimental.pallas import tpu as pltpu

EPS = 1e-5
MAXPAD = 2   # largest conv padding in the block (branch3 conv5 -> pad=2)


# ---------------------------------------------------------------------------
# Pallas kernel factory: one block of `nb` batch elements per grid step.
# All BN scales / conv biases are pre-folded into the packed weights/biases.
# ---------------------------------------------------------------------------
def _make_kernel(pack_lanes):
    def kernel(x_ref, w12_ref, b12_ref, w43_ref, b43_ref,
               wtail_ref, btail_ref, o_ref, hpad_ref):
        nb, lpad, cin = x_ref.shape
        L = lpad - 2 * MAXPAD
        cq2 = wtail_ref.shape[1]          # 2 * cq
        cq = cq2 // 2
        co = 4 * cq
        M = nb * L

        xp = x_ref[...]                                   # (nb, L+4, cin)

        # ---- fused 1x1 conv on x: [branch1 | branch2.conv1 (+bn2)] ---------
        xc = xp[:, MAXPAD:MAXPAD + L, :].reshape(M, cin)
        r12 = jnp.dot(xc, w12_ref[...], preferred_element_type=jnp.float32)
        r12 = r12 + b12_ref[0:1, :]

        # ---- fused conv3(pad=1) on x: [branch4 | branch3.conv1 (+bn3)] -----
        # Tap accumulation (no im2col concat): x is pre-padded by MAXPAD in HBM.
        r43 = jnp.dot(xp[:, 1:1 + L, :].reshape(M, cin), w43_ref[0],
                      preferred_element_type=jnp.float32)
        for k in range(1, 3):
            r43 = r43 + jnp.dot(xp[:, 1 + k:1 + k + L, :].reshape(M, cin),
                                w43_ref[k], preferred_element_type=jnp.float32)
        r43 = r43 + b43_ref[0:1, :]

        br1 = r12[:, :cq]
        br4 = r43[:, :cq]

        # ---- h2 / h3 (post bn+relu) into a zero-padded VMEM scratch --------
        h23 = jnp.concatenate([jnp.maximum(r12[:, cq:], 0.0),
                               jnp.maximum(r43[:, cq:], 0.0)], axis=-1)  # (M,2cq)
        zpad = jnp.zeros((nb, MAXPAD, cq2), hpad_ref.dtype)
        hpad_ref[:, :MAXPAD, :] = zpad
        hpad_ref[:, MAXPAD + L:, :] = zpad
        hpad_ref[:, MAXPAD:MAXPAD + L, :] = (
            h23.reshape(nb, L, cq2).astype(hpad_ref.dtype))

        # ---- fused tails: [branch2 conv3(pad=1) | branch3 conv5(pad=2)] ----
        # 5 block-diagonal taps of a (2cq, 2cq) weight (w2b only on taps 1..3).
        rt = jnp.dot(hpad_ref[:, 0:L, :].reshape(M, cq2), wtail_ref[0],
                     preferred_element_type=jnp.float32)
        for k in range(1, 5):
            rt = rt + jnp.dot(hpad_ref[:, k:k + L, :].reshape(M, cq2),
                              wtail_ref[k], preferred_element_type=jnp.float32)
        rt = rt + btail_ref[0:1, :]
        br2 = rt[:, :cq]
        br3 = rt[:, cq:]

        # ---- epilogue: final ReLU (final BN pre-folded) + single store -----
        y = jnp.maximum(jnp.concatenate([br1, br2, br3, br4], axis=-1), 0.0)
        if pack_lanes:
            # Lane-dense store: pack (L, co) into the lane dim so the store is
            # a dense vst instead of a co/128-masked partial store.
            y3 = y.reshape(nb, L, co)
            pieces = [y3[:, l:l + 1, :].reshape(nb, co) for l in range(L)]
            yd = jnp.concatenate(pieces, axis=-1)          # (nb, L*co)
            o_ref[...] = yd[None].astype(o_ref.dtype)      # block (1, nb, L*co)
        else:
            # co is a multiple of 128 -> (nb, L, co) store is already dense.
            o_ref[...] = y.reshape(nb, L, co).astype(o_ref.dtype)
    return kernel


# ---------------------------------------------------------------------------
# Host-side BN/bias folding and branch fusion of weights.
# ---------------------------------------------------------------------------
def _fold_bn(bn):
    g, b, m, v = bn[0], bn[1], bn[2], bn[3]
    scale = g / jnp.sqrt(v + EPS)
    shift = b - m * scale
    return scale, shift


def pack_params(p, compute_dtype=jnp.float32):
    cin, cq = p["w1"].shape
    sf, shf = _fold_bn(p["bnf"])
    s2, sh2 = _fold_bn(p["bn2"])
    s3, sh3 = _fold_bn(p["bn3"])
    sf1, sf2, sf3, sf4 = (sf[i * cq:(i + 1) * cq] for i in range(4))
    shf1, shf2, shf3, shf4 = (shf[i * cq:(i + 1) * cq] for i in range(4))

    # fused 1x1 on x: [branch1 (final-BN folded) | branch2.conv1 (bn2 folded)]
    w12 = jnp.concatenate([p["w1"] * sf1[None, :],
                           p["w2a"] * s2[None, :]], axis=1)           # (cin, 2cq)
    b12 = jnp.concatenate([p["b1"][0] * sf1 + shf1,
                           p["b2a"][0] * s2 + sh2])[None, :]          # (1, 2cq)

    # fused conv3(pad=1) on x, kept per-tap: [branch4 (final-BN) | branch3.conv1]
    w43 = jnp.concatenate([p["w4"] * sf4[None, None, :],
                           p["w3a"] * s3[None, None, :]], axis=2)     # (3, cin, 2cq)
    b43 = jnp.concatenate([p["b4"][0] * sf4 + shf4,
                           p["b3a"][0] * s3 + sh3])[None, :]

    # fused tail taps, block-diagonal: rows [h2 | h3] -> cols [br2 | br3]
    w2b = p["w2b"] * sf2[None, None, :]                               # (3, cq, cq)
    w3b = p["w3b"] * sf3[None, None, :]                               # (5, cq, cq)
    z = jnp.zeros((cq, cq), jnp.float32)
    taps = []
    for k in range(5):
        tl = w2b[k - 1] if 1 <= k <= 3 else z
        taps.append(jnp.concatenate(
            [jnp.concatenate([tl, z], axis=1),
             jnp.concatenate([z, w3b[k]], axis=1)], axis=0))          # (2cq, 2cq)
    wtail = jnp.stack(taps, axis=0)                                   # (5, 2cq, 2cq)
    btail = jnp.concatenate([p["b2b"][0] * sf2 + shf2,
                             p["b3b"][0] * sf3 + shf3])[None, :]

    cdt = compute_dtype
    return [w12.astype(cdt), b12.astype(jnp.float32),
            w43.astype(cdt), b43.astype(jnp.float32),
            wtail.astype(cdt), btail.astype(jnp.float32)]


# ---------------------------------------------------------------------------
# Block-size selection helpers (generation-aware VMEM budgeting)
# ---------------------------------------------------------------------------
def _vmem_budget_bytes():
    """Per-generation VMEM budget with headroom below physical capacity."""
    try:
        cap = int(pltpu.get_tpu_info().vmem_capacity_bytes)
    except Exception:
        cap = 64 * 1024 * 1024          # conservative fallback: v7x per-TC VMEM
    if cap <= 64 * 1024 * 1024:
        return 48 * 1024 * 1024         # v7x-class parts (64 MiB physical)
    return 100 * 1024 * 1024            # v5e / v6e (128 MiB physical)


def _per_batch_vmem_bytes(L, cin, cq, in_item, out_item):
    """Rough per-batch-element VMEM footprint of one grid step."""
    co, cq2 = 4 * cq, 2 * cq
    lp = L + 2 * MAXPAD
    b = 2 * lp * cin * in_item            # x block (double-buffered)
    b += 2 * L * co * out_item            # out block (double-buffered)
    b += lp * cq2 * in_item               # padded h2/h3 scratch
    b += L * (2 * cq2 + cq2 + co) * 4     # f32 accumulators (r12, r43, tail, y)
    b += 2 * L * max(cin, cq2, co) * 4    # slice / relayout temporaries
    return int(b * 1.5) + 1               # headroom for compiler temporaries


def _choose_batch_block(N, L, per_batch_bytes, budget_bytes):
    """Largest batch block fitting the VMEM budget; prefers a divisor of N
    (no padded rows) and keeps >= 2 grid steps for the parallel axis."""
    nb = max(1, min(N, budget_bytes // max(per_batch_bytes, 1)))
    nb = min(nb, max(1, 8192 // max(L, 1)))    # cap rows (M = nb*L) per step
    if N >= 2:
        nb = min(nb, (N + 1) // 2)             # >= 2 steps (v7x: 2 TensorCores)
    best_div = 1
    for cand in range(nb, 0, -1):
        if N % cand == 0:
            best_div = cand
            break
    # take the divisor unless it would shrink the block more than 2x
    return best_div if 2 * best_div >= nb else nb


# ---------------------------------------------------------------------------
# Wrapper
# ---------------------------------------------------------------------------
def inception_forward(x_nlc, params, *, batch_block=None,
                      compute_dtype=jnp.bfloat16, out_dtype=jnp.float32):
    N, L, cin = x_nlc.shape
    cq = params["w1"].shape[1]
    co = 4 * cq
    cq2 = 2 * cq

    weights = pack_params(params, compute_dtype)
    in_item = jnp.dtype(compute_dtype).itemsize
    out_item = jnp.dtype(out_dtype).itemsize

    budget = _vmem_budget_bytes()
    if batch_block is None:
        per_b = _per_batch_vmem_bytes(L, cin, cq, in_item, out_item)
        nb = _choose_batch_block(N, L, per_b, budget)
    else:
        nb = max(1, min(batch_block, N))
    n_steps = pl.cdiv(N, nb)
    Np = n_steps * nb

    # Pre-pad: L by the max conv pad (removes in-kernel zero-padding of x) and
    # batch up to a multiple of the block (usually a no-op: nb divides N).
    x_pad = jnp.pad(x_nlc, ((0, Np - N), (MAXPAD, MAXPAD), (0, 0)))
    x_pad = x_pad.astype(compute_dtype)

    # Lane-dense output presentation when the natural last dim (co) is narrow.
    pack_lanes = (co % 128 != 0) and (L <= 64)

    def full_spec(a):
        nd = a.ndim
        return pl.BlockSpec(a.shape, lambda n, _nd=nd: (0,) * _nd)

    in_specs = ([pl.BlockSpec((nb, L + 2 * MAXPAD, cin), lambda n: (n, 0, 0))]
                + [full_spec(a) for a in weights])

    if pack_lanes:
        out_shape = jax.ShapeDtypeStruct((n_steps, nb, L * co), out_dtype)
        out_spec = pl.BlockSpec((1, nb, L * co), lambda n: (n, 0, 0))
    else:
        out_shape = jax.ShapeDtypeStruct((Np, L, co), out_dtype)
        out_spec = pl.BlockSpec((nb, L, co), lambda n: (n, 0, 0))

    flops = 2 * Np * L * (cin * cq2 + 3 * cin * cq2 + 5 * cq2 * cq2)
    bytes_accessed = (int(x_pad.size) * in_item + Np * L * co * out_item
                      + sum(int(w.size) * w.dtype.itemsize for w in weights))

    out = pl.pallas_call(
        _make_kernel(pack_lanes),
        out_shape=out_shape,
        grid_spec=pltpu.PrefetchScalarGridSpec(
            num_scalar_prefetch=0,
            grid=(n_steps,),
            in_specs=in_specs,
            out_specs=out_spec,
            scratch_shapes=[pltpu.VMEM((nb, L + 2 * MAXPAD, cq2),
                                       compute_dtype)],
        ),
        compiler_params=pltpu.CompilerParams(
            dimension_semantics=("parallel",),
            vmem_limit_bytes=budget),
        cost_estimate=pl.CostEstimate(flops=int(flops), transcendentals=0,
                                      bytes_accessed=int(bytes_accessed)),
    )(x_pad, *weights)

    out = out.reshape(Np, L, co)
    return out[:N]


# ---------------------------------------------------------------------------
# Deterministic parameter init (shapes follow Inception(cin, co))
#   conv weight stored as (K, Cin, Cout)  (transposed vs torch's (Cout,Cin,K))
#   biases stored as (1, Cout); BN packs (gamma, beta, mean, var) as (4, C)
# ---------------------------------------------------------------------------
def init_params(key, cin, co):
    assert co % 4 == 0
    cq = co // 4
    ks = jax.random.split(key, 15)

    def nrm(k, shape, scale=0.3):
        return scale * jax.random.normal(k, shape, jnp.float32)

    def bn_params(k, c):
        k1, k2, k3, k4 = jax.random.split(k, 4)
        gamma = 1.0 + 0.1 * jax.random.normal(k1, (c,), jnp.float32)
        beta = 0.1 * jax.random.normal(k2, (c,), jnp.float32)
        mean = 0.1 * jax.random.normal(k3, (c,), jnp.float32)
        var = 1.0 + 0.1 * jnp.abs(jax.random.normal(k4, (c,), jnp.float32))
        return jnp.stack([gamma, beta, mean, var], axis=0)      # (4, C)

    return dict(
        w1=nrm(ks[0], (cin, cq)),          b1=nrm(ks[1], (1, cq)),
        w2a=nrm(ks[2], (cin, cq)),         b2a=nrm(ks[3], (1, cq)),
        bn2=bn_params(ks[4], cq),
        w2b=nrm(ks[5], (3, cq, cq)),       b2b=nrm(ks[6], (1, cq)),
        w3a=nrm(ks[7], (3, cin, cq)),      b3a=nrm(ks[8], (1, cq)),
        bn3=bn_params(ks[9], cq),
        w3b=nrm(ks[10], (5, cq, cq)),      b3b=nrm(ks[11], (1, cq)),
        w4=nrm(ks[12], (3, cin, cq)),      b4=nrm(ks[13], (1, cq)),
        bnf=bn_params(ks[14], co),
    )


# ---------------------------------------------------------------------------
# Pure-JAX reference (unfolded math, matches the torch module) for checking
# ---------------------------------------------------------------------------
def _ref_forward(x_nlc, p):
    def conv1(x, w, b):
        return x @ w + b

    def convK(x, w, b, pad):
        L, cin = x.shape
        xp = jnp.concatenate(
            [jnp.zeros((pad, cin)), x, jnp.zeros((pad, cin))], axis=0)
        out = sum(xp[k:k + L] @ w[k] for k in range(w.shape[0]))
        return out + b

    def bn(y, bnp):
        g, be, m, v = bnp[0], bnp[1], bnp[2], bnp[3]
        return (y - m) * g / jnp.sqrt(v + EPS) + be

    def one(x):
        br1 = conv1(x, p["w1"], p["b1"][0])
        h2 = jnp.maximum(bn(conv1(x, p["w2a"], p["b2a"][0]), p["bn2"]), 0.0)
        br2 = convK(h2, p["w2b"], p["b2b"][0], 1)
        h3 = jnp.maximum(bn(convK(x, p["w3a"], p["b3a"][0], 1), p["bn3"]), 0.0)
        br3 = convK(h3, p["w3b"], p["b3b"][0], 2)
        br4 = convK(x, p["w4"], p["b4"][0], 1)
        y = jnp.concatenate([br1, br2, br3, br4], axis=-1)
        return jnp.maximum(bn(y, p["bnf"]), 0.0)

    return jax.vmap(one)(x_nlc)


if __name__ == "__main__":
    key = jax.random.PRNGKey(0)
    kx, kp = jax.random.split(key)

    N, cin, L, co = 4, 4, 16, 8                  # Inception(cin=4, co=8)
    x_ncl = jax.random.normal(kx, (N, cin, L), jnp.float32)   # torch-style NCL
    x_nlc = jnp.transpose(x_ncl, (0, 2, 1))                   # kernel layout NLC

    params = init_params(kp, cin, co)
    ref = _ref_forward(x_nlc, params)

    # f32 MXU inputs: tight reference check.
    out_f32 = inception_forward(x_nlc, params, compute_dtype=jnp.float32)
    out_f32 = jax.block_until_ready(out_f32)
    assert out_f32.shape == (N, L, co)
    if not jnp.allclose(out_f32, ref, atol=1e-4, rtol=1e-4):
        raise AssertionError("Pallas kernel (f32) does not match reference")

    # bf16 MXU inputs (the default path; accumulation stays f32): loose check.
    out_bf16 = inception_forward(x_nlc, params, compute_dtype=jnp.bfloat16)
    out_bf16 = jax.block_until_ready(out_bf16)
    assert out_bf16.shape == (N, L, co)
    if not jnp.allclose(out_bf16, ref, atol=8e-2, rtol=8e-2):
        raise AssertionError("Pallas kernel (bf16) does not match reference")

    print("KERNEL_OK")
</pallas_src>

<mosaic_0001>
module attributes {stable_mosaic.version = 11 : i64} {
  func.func @kernel(%arg0: i32, %arg1: memref<2x20x4xf32, #tpu.memory_space<vmem>>, %arg2: memref<4x4xf32, #tpu.memory_space<vmem>>, %arg3: memref<1x4xf32, #tpu.memory_space<vmem>>, %arg4: memref<3x4x4xf32, #tpu.memory_space<vmem>>, %arg5: memref<1x4xf32, #tpu.memory_space<vmem>>, %arg6: memref<5x4x4xf32, #tpu.memory_space<vmem>>, %arg7: memref<1x4xf32, #tpu.memory_space<vmem>>, %arg8: memref<1x2x128xf32, #tpu.memory_space<vmem>>, %arg9: memref<2x20x4xf32, #tpu.memory_space<vmem>>) attributes {dimension_semantics = [#tpu.dimension_semantics<parallel>], iteration_bounds = array<i64: 2>, scalar_prefetch = 0 : i64, scratch_operands = 1 : i64, tpu.core_type = #tpu.core_type<tc>, window_params = [{transform_indices = @transform_0, window_bounds = array<i64: 2, 20, 4>}, {pipeline_mode = #tpu.pipeline_mode<synchronous>, transform_indices = @transform_1, window_bounds = array<i64: 4, 4>}, {pipeline_mode = #tpu.pipeline_mode<synchronous>, transform_indices = @transform_2, window_bounds = array<i64: 1, 4>}, {pipeline_mode = #tpu.pipeline_mode<synchronous>, transform_indices = @transform_3, window_bounds = array<i64: 3, 4, 4>}, {pipeline_mode = #tpu.pipeline_mode<synchronous>, transform_indices = @transform_4, window_bounds = array<i64: 1, 4>}, {pipeline_mode = #tpu.pipeline_mode<synchronous>, transform_indices = @transform_5, window_bounds = array<i64: 5, 4, 4>}, {pipeline_mode = #tpu.pipeline_mode<synchronous>, transform_indices = @transform_6, window_bounds = array<i64: 1, 4>}, {transform_indices = @transform_7, window_bounds = array<i64: 1, 2, 128>}]} {
    %c0 = arith.constant 0 : index
    %c0_0 = arith.constant 0 : index
    %c0_1 = arith.constant 0 : index
    %0 = vector.load %arg1[%c0, %c0_0, %c0_1] : memref<2x20x4xf32, #tpu.memory_space<vmem>>, vector<2x20x4xf32>
    %1 = vector.extract_strided_slice %0 {offsets = [0, 2, 0], sizes = [2, 16, 4], strides = [1, 1, 1]} : vector<2x20x4xf32> to vector<2x16x4xf32>
    %2 = vector.shape_cast %1 : vector<2x16x4xf32> to vector<32x4xf32>
    %c0_2 = arith.constant 0 : index
    %c0_3 = arith.constant 0 : index
    %3 = vector.load %arg2[%c0_2, %c0_3] : memref<4x4xf32, #tpu.memory_space<vmem>>, vector<4x4xf32>
    %cst = arith.constant dense<0.000000e+00> : vector<32x4xf32>
    %4 = tpu.matmul %2, %3, %cst {dimension_numbers = #tpu.dot_dimension_numbers<[1], [0], [0], [1], [0, 0, 1, 1], [], []>} : vector<32x4xf32>, vector<4x4xf32>, vector<32x4xf32> -> vector<32x4xf32>
    %c0_4 = arith.constant 0 : index
    %c0_5 = arith.constant 0 : index
    %5 = vector.load %arg3[%c0_4, %c0_5] : memref<1x4xf32, #tpu.memory_space<vmem>>, vector<1x4xf32>
    %6 = vector.broadcast %5 : vector<1x4xf32> to vector<32x4xf32>
    %7 = arith.addf %4, %6 : vector<32x4xf32>
    %8 = vector.extract_strided_slice %0 {offsets = [0, 1, 0], sizes = [2, 16, 4], strides = [1, 1, 1]} : vector<2x20x4xf32> to vector<2x16x4xf32>
    %9 = vector.shape_cast %8 : vector<2x16x4xf32> to vector<32x4xf32>
    %c0_6 = arith.constant 0 : index
    %c0_7 = arith.constant 0 : index
    %c0_8 = arith.constant 0 : index
    %10 = vector.load %arg4[%c0_6, %c0_7, %c0_8] : memref<3x4x4xf32, #tpu.memory_space<vmem>>, vector<1x4x4xf32>
    %11 = vector.shape_cast %10 : vector<1x4x4xf32> to vector<4x4xf32>
    %cst_9 = arith.constant dense<0.000000e+00> : vector<32x4xf32>
    %12 = tpu.matmul %9, %11, %cst_9 {dimension_numbers = #tpu.dot_dimension_numbers<[1], [0], [0], [1], [0, 0, 1, 1], [], []>} : vector<32x4xf32>, vector<4x4xf32>, vector<32x4xf32> -> vector<32x4xf32>
    %13 = vector.extract_strided_slice %0 {offsets = [0, 2, 0], sizes = [2, 16, 4], strides = [1, 1, 1]} : vector<2x20x4xf32> to vector<2x16x4xf32>
    %14 = vector.shape_cast %13 : vector<2x16x4xf32> to vector<32x4xf32>
    %c1 = arith.constant 1 : index
    %c0_10 = arith.constant 0 : index
    %c0_11 = arith.constant 0 : index
    %15 = vector.load %arg4[%c1, %c0_10, %c0_11] : memref<3x4x4xf32, #tpu.memory_space<vmem>>, vector<1x4x4xf32>
    %16 = vector.shape_cast %15 : vector<1x4x4xf32> to vector<4x4xf32>
    %cst_12 = arith.constant dense<0.000000e+00> : vector<32x4xf32>
    %17 = tpu.matmul %14, %16, %cst_12 {dimension_numbers = #tpu.dot_dimension_numbers<[1], [0], [0], [1], [0, 0, 1, 1], [], []>} : vector<32x4xf32>, vector<4x4xf32>, vector<32x4xf32> -> vector<32x4xf32>
    %18 = arith.addf %12, %17 : vector<32x4xf32>
    %19 = vector.extract_strided_slice %0 {offsets = [0, 3, 0], sizes = [2, 16, 4], strides = [1, 1, 1]} : vector<2x20x4xf32> to vector<2x16x4xf32>
    %20 = vector.shape_cast %19 : vector<2x16x4xf32> to vector<32x4xf32>
    %c2 = arith.constant 2 : index
    %c0_13 = arith.constant 0 : index
    %c0_14 = arith.constant 0 : index
    %21 = vector.load %arg4[%c2, %c0_13, %c0_14] : memref<3x4x4xf32, #tpu.memory_space<vmem>>, vector<1x4x4xf32>
    %22 = vector.shape_cast %21 : vector<1x4x4xf32> to vector<4x4xf32>
    %cst_15 = arith.constant dense<0.000000e+00> : vector<32x4xf32>
    %23 = tpu.matmul %20, %22, %cst_15 {dimension_numbers = #tpu.dot_dimension_numbers<[1], [0], [0], [1], [0, 0, 1, 1], [], []>} : vector<32x4xf32>, vector<4x4xf32>, vector<32x4xf32> -> vector<32x4xf32>
    %24 = arith.addf %18, %23 : vector<32x4xf32>
    %c0_16 = arith.constant 0 : index
    %c0_17 = arith.constant 0 : index
    %25 = vector.load %arg5[%c0_16, %c0_17] : memref<1x4xf32, #tpu.memory_space<vmem>>, vector<1x4xf32>
    %26 = vector.broadcast %25 : vector<1x4xf32> to vector<32x4xf32>
    %27 = arith.addf %24, %26 : vector<32x4xf32>
    %28 = vector.extract_strided_slice %7 {offsets = [0, 0], sizes = [32, 2], strides = [1, 1]} : vector<32x4xf32> to vector<32x2xf32>
    %29 = vector.extract_strided_slice %27 {offsets = [0, 0], sizes = [32, 2], strides = [1, 1]} : vector<32x4xf32> to vector<32x2xf32>
    %30 = vector.extract_strided_slice %7 {offsets = [0, 2], sizes = [32, 2], strides = [1, 1]} : vector<32x4xf32> to vector<32x2xf32>
    %cst_18 = arith.constant 0.000000e+00 : f32
    %31 = vector.broadcast %cst_18 : f32 to vector<32x2xf32>
    %32 = arith.maximumf %30, %31 : vector<32x2xf32>
    %33 = vector.extract_strided_slice %27 {offsets = [0, 2], sizes = [32, 2], strides = [1, 1]} : vector<32x4xf32> to vector<32x2xf32>
    %cst_19 = arith.constant 0.000000e+00 : f32
    %34 = vector.broadcast %cst_19 : f32 to vector<32x2xf32>
    %35 = arith.maximumf %33, %34 : vector<32x2xf32>
    %36 = tpu.concatenate %32, %35 in 1 : vector<32x2xf32>, vector<32x2xf32> -> vector<32x4xf32>
    %cst_20 = arith.constant 0.000000e+00 : f32
    %37 = vector.broadcast %cst_20 : f32 to vector<2x2x4xf32>
    %c0_21 = arith.constant 0 : index
    %c0_22 = arith.constant 0 : index
    %c0_23 = arith.constant 0 : index
    %38 = vector.load %arg9[%c0_21, %c0_22, %c0_23] : memref<2x20x4xf32, #tpu.memory_space<vmem>>, vector<2x2x4xf32>
    tpu.vector_store %arg9[%c0_21, %c0_22, %c0_23], %37 {strides = array<i32>} : memref<2x20x4xf32, #tpu.memory_space<vmem>>, vector<2x2x4xf32>,
    %c0_24 = arith.constant 0 : index
    %c18 = arith.constant 18 : index
    %c0_25 = arith.constant 0 : index
    %39 = vector.load %arg9[%c0_24, %c18, %c0_25] : memref<2x20x4xf32, #tpu.memory_space<vmem>>, vector<2x2x4xf32>
    tpu.vector_store %arg9[%c0_24, %c18, %c0_25], %37 {strides = array<i32>} : memref<2x20x4xf32, #tpu.memory_space<vmem>>, vector<2x2x4xf32>,
    %40 = vector.shape_cast %36 : vector<32x4xf32> to vector<2x16x4xf32>
    %c0_26 = arith.constant 0 : index
    %c2_27 = arith.constant 2 : index
    %c0_28 = arith.constant 0 : index
    %41 = vector.load %arg9[%c0_26, %c2_27, %c0_28] : memref<2x20x4xf32, #tpu.memory_space<vmem>>, vector<2x16x4xf32>
    tpu.vector_store %arg9[%c0_26, %c2_27, %c0_28], %40 {strides = array<i32>} : memref<2x20x4xf32, #tpu.memory_space<vmem>>, vector<2x16x4xf32>,
    %c0_29 = arith.constant 0 : index
    %c0_30 = arith.constant 0 : index
    %c0_31 = arith.constant 0 : index
    %42 = vector.load %arg9[%c0_29, %c0_30, %c0_31] : memref<2x20x4xf32, #tpu.memory_space<vmem>>, vector<2x16x4xf32>
    %43 = vector.shape_cast %42 : vector<2x16x4xf32> to vector<32x4xf32>
    %c0_32 = arith.constant 0 : index
    %c0_33 = arith.constant 0 : index
    %c0_34 = arith.constant 0 : index
    %44 = vector.load %arg6[%c0_32, %c0_33, %c0_34] : memref<5x4x4xf32, #tpu.memory_space<vmem>>, vector<1x4x4xf32>
    %45 = vector.shape_cast %44 : vector<1x4x4xf32> to vector<4x4xf32>
    %cst_35 = arith.constant dense<0.000000e+00> : vector<32x4xf32>
    %46 = tpu.matmul %43, %45, %cst_35 {dimension_numbers = #tpu.dot_dimension_numbers<[1], [0], [0], [1], [0, 0, 1, 1], [], []>} : vector<32x4xf32>, vector<4x4xf32>, vector<32x4xf32> -> vector<32x4xf32>
    %c0_36 = arith.constant 0 : index
    %c1_37 = arith.constant 1 : index
    %c0_38 = arith.constant 0 : index
    %47 = vector.load %arg9[%c0_36, %c1_37, %c0_38] : memref<2x20x4xf32, #tpu.memory_space<vmem>>, vector<2x16x4xf32>
    %48 = vector.shape_cast %47 : vector<2x16x4xf32> to vector<32x4xf32>
    %c1_39 = arith.constant 1 : index
    %c0_40 = arith.constant 0 : index
    %c0_41 = arith.constant 0 : index
    %49 = vector.load %arg6[%c1_39, %c0_40, %c0_41] : memref<5x4x4xf32, #tpu.memory_space<vmem>>, vector<1x4x4xf32>
    %50 = vector.shape_cast %49 : vector<1x4x4xf32> to vector<4x4xf32>
    %cst_42 = arith.constant dense<0.000000e+00> : vector<32x4xf32>
    %51 = tpu.matmul %48, %50, %cst_42 {dimension_numbers = #tpu.dot_dimension_numbers<[1], [0], [0], [1], [0, 0, 1, 1], [], []>} : vector<32x4xf32>, vector<4x4xf32>, vector<32x4xf32> -> vector<32x4xf32>
    %52 = arith.addf %46, %51 : vector<32x4xf32>
    %c0_43 = arith.constant 0 : index
    %c2_44 = arith.constant 2 : index
    %c0_45 = arith.constant 0 : index
    %53 = vector.load %arg9[%c0_43, %c2_44, %c0_45] : memref<2x20x4xf32, #tpu.memory_space<vmem>>, vector<2x16x4xf32>
    %54 = vector.shape_cast %53 : vector<2x16x4xf32> to vector<32x4xf32>
    %c2_46 = arith.constant 2 : index
    %c0_47 = arith.constant 0 : index
    %c0_48 = arith.constant 0 : index
    %55 = vector.load %arg6[%c2_46, %c0_47, %c0_48] : memref<5x4x4xf32, #tpu.memory_space<vmem>>, vector<1x4x4xf32>
    %56 = vector.shape_cast %55 : vector<1x4x4xf32> to vector<4x4xf32>
    %cst_49 = arith.constant dense<0.000000e+00> : vector<32x4xf32>
    %57 = tpu.matmul %54, %56, %cst_49 {dimension_numbers = #tpu.dot_dimension_numbers<[1], [0], [0], [1], [0, 0, 1, 1], [], []>} : vector<32x4xf32>, vector<4x4xf32>, vector<32x4xf32> -> vector<32x4xf32>
    %58 = arith.addf %52, %57 : vector<32x4xf32>
    %c0_50 = arith.constant 0 : index
    %c3 = arith.constant 3 : index
    %c0_51 = arith.constant 0 : index
    %59 = vector.load %arg9[%c0_50, %c3, %c0_51] : memref<2x20x4xf32, #tpu.memory_space<vmem>>, vector<2x16x4xf32>
    %60 = vector.shape_cast %59 : vector<2x16x4xf32> to vector<32x4xf32>
    %c3_52 = arith.constant 3 : index
    %c0_53 = arith.constant 0 : index
    %c0_54 = arith.constant 0 : index
    %61 = vector.load %arg6[%c3_52, %c0_53, %c0_54] : memref<5x4x4xf32, #tpu.memory_space<vmem>>, vector<1x4x4xf32>
    %62 = vector.shape_cast %61 : vector<1x4x4xf32> to vector<4x4xf32>
    %cst_55 = arith.constant dense<0.000000e+00> : vector<32x4xf32>
    %63 = tpu.matmul %60, %62, %cst_55 {dimension_numbers = #tpu.dot_dimension_numbers<[1], [0], [0], [1], [0, 0, 1, 1], [], []>} : vector<32x4xf32>, vector<4x4xf32>, vector<32x4xf32> -> vector<32x4xf32>
    %64 = arith.addf %58, %63 : vector<32x4xf32>
    %c0_56 = arith.constant 0 : index
    %c4 = arith.constant 4 : index
    %c0_57 = arith.constant 0 : index
    %65 = vector.load %arg9[%c0_56, %c4, %c0_57] : memref<2x20x4xf32, #tpu.memory_space<vmem>>, vector<2x16x4xf32>
    %66 = vector.shape_cast %65 : vector<2x16x4xf32> to vector<32x4xf32>
    %c4_58 = arith.constant 4 : index
    %c0_59 = arith.constant 0 : index
    %c0_60 = arith.constant 0 : index
    %67 = vector.load %arg6[%c4_58, %c0_59, %c0_60] : memref<5x4x4xf32, #tpu.memory_space<vmem>>, vector<1x4x4xf32>
    %68 = vector.shape_cast %67 : vector<1x4x4xf32> to vector<4x4xf32>
    %cst_61 = arith.constant dense<0.000000e+00> : vector<32x4xf32>
    %69 = tpu.matmul %66, %68, %cst_61 {dimension_numbers = #tpu.dot_dimension_numbers<[1], [0], [0], [1], [0, 0, 1, 1], [], []>} : vector<32x4xf32>, vector<4x4xf32>, vector<32x4xf32> -> vector<32x4xf32>
    %70 = arith.addf %64, %69 : vector<32x4xf32>
    %c0_62 = arith.constant 0 : index
    %c0_63 = arith.constant 0 : index
    %71 = vector.load %arg7[%c0_62, %c0_63] : memref<1x4xf32, #tpu.memory_space<vmem>>, vector<1x4xf32>
    %72 = vector.broadcast %71 : vector<1x4xf32> to vector<32x4xf32>
    %73 = arith.addf %70, %72 : vector<32x4xf32>
    %74 = vector.extract_strided_slice %73 {offsets = [0, 0], sizes = [32, 2], strides = [1, 1]} : vector<32x4xf32> to vector<32x2xf32>
    %75 = vector.extract_strided_slice %73 {offsets = [0, 2], sizes = [32, 2], strides = [1, 1]} : vector<32x4xf32> to vector<32x2xf32>
    %76 = tpu.concatenate %28, %74, %75, %29 in 1 : vector<32x2xf32>, vector<32x2xf32>, vector<32x2xf32>, vector<32x2xf32> -> vector<32x8xf32>
    %cst_64 = arith.constant 0.000000e+00 : f32
    %77 = vector.broadcast %cst_64 : f32 to vector<32x8xf32>
    %78 = arith.maximumf %76, %77 : vector<32x8xf32>
    %79 = vector.shape_cast %78 : vector<32x8xf32> to vector<2x16x8xf32>
    %80 = vector.extract_strided_slice %79 {offsets = [0, 0, 0], sizes = [2, 1, 8], strides = [1, 1, 1]} : vector<2x16x8xf32> to vector<2x1x8xf32>
    %81 = vector.shape_cast %80 : vector<2x1x8xf32> to vector<2x8xf32>
    %82 = vector.extract_strided_slice %79 {offsets = [0, 1, 0], sizes = [2, 1, 8], strides = [1, 1, 1]} : vector<2x16x8xf32> to vector<2x1x8xf32>
    %83 = vector.shape_cast %82 : vector<2x1x8xf32> to vector<2x8xf32>
    %84 = vector.extract_strided_slice %79 {offsets = [0, 2, 0], sizes = [2, 1, 8], strides = [1, 1, 1]} : vector<2x16x8xf32> to vector<2x1x8xf32>
    %85 = vector.shape_cast %84 : vector<2x1x8xf32> to vector<2x8xf32>
    %86 = vector.extract_strided_slice %79 {offsets = [0, 3, 0], sizes = [2, 1, 8], strides = [1, 1, 1]} : vector<2x16x8xf32> to vector<2x1x8xf32>
    %87 = vector.shape_cast %86 : vector<2x1x8xf32> to vector<2x8xf32>
    %88 = vector.extract_strided_slice %79 {offsets = [0, 4, 0], sizes = [2, 1, 8], strides = [1, 1, 1]} : vector<2x16x8xf32> to vector<2x1x8xf32>
    %89 = vector.shape_cast %88 : vector<2x1x8xf32> to vector<2x8xf32>
    %90 = vector.extract_strided_slice %79 {offsets = [0, 5, 0], sizes = [2, 1, 8], strides = [1, 1, 1]} : vector<2x16x8xf32> to vector<2x1x8xf32>
    %91 = vector.shape_cast %90 : vector<2x1x8xf32> to vector<2x8xf32>
    %92 = vector.extract_strided_slice %79 {offsets = [0, 6, 0], sizes = [2, 1, 8], strides = [1, 1, 1]} : vector<2x16x8xf32> to vector<2x1x8xf32>
    %93 = vector.shape_cast %92 : vector<2x1x8xf32> to vector<2x8xf32>
    %94 = vector.extract_strided_slice %79 {offsets = [0, 7, 0], sizes = [2, 1, 8], strides = [1, 1, 1]} : vector<2x16x8xf32> to vector<2x1x8xf32>
    %95 = vector.shape_cast %94 : vector<2x1x8xf32> to vector<2x8xf32>
    %96 = vector.extract_strided_slice %79 {offsets = [0, 8, 0], sizes = [2, 1, 8], strides = [1, 1, 1]} : vector<2x16x8xf32> to vector<2x1x8xf32>
    %97 = vector.shape_cast %96 : vector<2x1x8xf32> to vector<2x8xf32>
    %98 = vector.extract_strided_slice %79 {offsets = [0, 9, 0], sizes = [2, 1, 8], strides = [1, 1, 1]} : vector<2x16x8xf32> to vector<2x1x8xf32>
    %99 = vector.shape_cast %98 : vector<2x1x8xf32> to vector<2x8xf32>
    %100 = vector.extract_strided_slice %79 {offsets = [0, 10, 0], sizes = [2, 1, 8], strides = [1, 1, 1]} : vector<2x16x8xf32> to vector<2x1x8xf32>
    %101 = vector.shape_cast %100 : vector<2x1x8xf32> to vector<2x8xf32>
    %102 = vector.extract_strided_slice %79 {offsets = [0, 11, 0], sizes = [2, 1, 8], strides = [1, 1, 1]} : vector<2x16x8xf32> to vector<2x1x8xf32>
    %103 = vector.shape_cast %102 : vector<2x1x8xf32> to vector<2x8xf32>
    %104 = vector.extract_strided_slice %79 {offsets = [0, 12, 0], sizes = [2, 1, 8], strides = [1, 1, 1]} : vector<2x16x8xf32> to vector<2x1x8xf32>
    %105 = vector.shape_cast %104 : vector<2x1x8xf32> to vector<2x8xf32>
    %106 = vector.extract_strided_slice %79 {offsets = [0, 13, 0], sizes = [2, 1, 8], strides = [1, 1, 1]} : vector<2x16x8xf32> to vector<2x1x8xf32>
    %107 = vector.shape_cast %106 : vector<2x1x8xf32> to vector<2x8xf32>
    %108 = vector.extract_strided_slice %79 {offsets = [0, 14, 0], sizes = [2, 1, 8], strides = [1, 1, 1]} : vector<2x16x8xf32> to vector<2x1x8xf32>
    %109 = vector.shape_cast %108 : vector<2x1x8xf32> to vector<2x8xf32>
    %110 = vector.extract_strided_slice %79 {offsets = [0, 15, 0], sizes = [2, 1, 8], strides = [1, 1, 1]} : vector<2x16x8xf32> to vector<2x1x8xf32>
    %111 = vector.shape_cast %110 : vector<2x1x8xf32> to vector<2x8xf32>
    %112 = tpu.concatenate %81, %83, %85, %87, %89, %91, %93, %95, %97, %99, %101, %103, %105, %107, %109, %111 in 1 : vector<2x8xf32>, vector<2x8xf32>, vector<2x8xf32>, vector<2x8xf32>, vector<2x8xf32>, vector<2x8xf32>, vector<2x8xf32>, vector<2x8xf32>, vector<2x8xf32>, vector<2x8xf32>, vector<2x8xf32>, vector<2x8xf32>, vector<2x8xf32>, vector<2x8xf32>, vector<2x8xf32>, vector<2x8xf32> -> vector<2x128xf32>
    %113 = vector.shape_cast %112 : vector<2x128xf32> to vector<1x2x128xf32>
    %c0_65 = arith.constant 0 : index
    %c0_66 = arith.constant 0 : index
    %c0_67 = arith.constant 0 : index
    %114 = vector.load %arg8[%c0_65, %c0_66, %c0_67] : memref<1x2x128xf32, #tpu.memory_space<vmem>>, vector<1x2x128xf32>
    tpu.vector_store %arg8[%c0_65, %c0_66, %c0_67], %113 {strides = array<i32>} : memref<1x2x128xf32, #tpu.memory_space<vmem>>, vector<1x2x128xf32>,
    return
  }
  func.func @transform_0(%arg0: i32) -> (i32, i32, i32) {
    %c0_i32 = arith.constant 0 : i32
    %c0_i32_0 = arith.constant 0 : i32
    %c0_i32_1 = arith.constant 0 : i32
    return %arg0, %c0_i32, %c0_i32_0 : i32, i32, i32
  }
  func.func @transform_1(%arg0: i32) -> (i32, i32) {
    %c0_i32 = arith.constant 0 : i32
    %c0_i32_0 = arith.constant 0 : i32
    %c0_i32_1 = arith.constant 0 : i32
    return %c0_i32, %c0_i32_0 : i32, i32
  }
  func.func @transform_2(%arg0: i32) -> (i32, i32) {
    %c0_i32 = arith.constant 0 : i32
    %c0_i32_0 = arith.constant 0 : i32
    %c0_i32_1 = arith.constant 0 : i32
    return %c0_i32, %c0_i32_0 : i32, i32
  }
  func.func @transform_3(%arg0: i32) -> (i32, i32, i32) {
    %c0_i32 = arith.constant 0 : i32
    %c0_i32_0 = arith.constant 0 : i32
    %c0_i32_1 = arith.constant 0 : i32
    %c0_i32_2 = arith.constant 0 : i32
    return %c0_i32, %c0_i32_0, %c0_i32_1 : i32, i32, i32
  }
  func.func @transform_4(%arg0: i32) -> (i32, i32) {
    %c0_i32 = arith.constant 0 : i32
    %c0_i32_0 = arith.constant 0 : i32
    %c0_i32_1 = arith.constant 0 : i32
    return %c0_i32, %c0_i32_0 : i32, i32
  }
  func.func @transform_5(%arg0: i32) -> (i32, i32, i32) {
    %c0_i32 = arith.constant 0 : i32
    %c0_i32_0 = arith.constant 0 : i32
    %c0_i32_1 = arith.constant 0 : i32
    %c0_i32_2 = arith.constant 0 : i32
    return %c0_i32, %c0_i32_0, %c0_i32_1 : i32, i32, i32
  }
  func.func @transform_6(%arg0: i32) -> (i32, i32) {
    %c0_i32 = arith.constant 0 : i32
    %c0_i32_0 = arith.constant 0 : i32
    %c0_i32_1 = arith.constant 0 : i32
    return %c0_i32, %c0_i32_0 : i32, i32
  }
  func.func @transform_7(%arg0: i32) -> (i32, i32, i32) {
    %c0_i32 = arith.constant 0 : i32
    %c0_i32_0 = arith.constant 0 : i32
    %c0_i32_1 = arith.constant 0 : i32
    return %arg0, %c0_i32, %c0_i32_0 : i32, i32, i32
  }
}

</mosaic_0001>

<bundles_post_ra>
// kernel: tpu_custom_call.1
= control target key start
LH: loop header
LB: loop body
LE: loop exit
PB: predicated region body
PF: predicated region fallthrough
CT: control target
= control target key end

     0   :  { %12 = vsyncpa [#allocation4], 0  ;;  %s2237_s0 = inlined_call_operand.vmem [shape: f32[4,20,4], index: 0, kind: input, shape index: {}]   ;;  %s2238_s1 = inlined_call_operand.vmem [shape: f32[4,4], index: 1, kind: input, shape index: {}]   ;;  %s2239_s2 = inlined_call_operand.vmem [shape: f32[1,4], index: 2, kind: input, shape index: {}]   ;;  %s2240_s3 = inlined_call_operand.vmem [shape: f32[3,4,4], index: 3, kind: input, shape index: {}]   ;;  %s2241_s4 = inlined_call_operand.vmem [shape: f32[1,4], index: 4, kind: input, shape index: {}]   ;;  %s2242_s5 = inlined_call_operand.vmem [shape: f32[5,4,4], index: 5, kind: input, shape index: {}]   ;;  %s2243_s6 = inlined_call_operand.vmem [shape: f32[1,4], index: 6, kind: input, shape index: {}]   ;;  %s2244_s7 = inlined_call_operand.hbm [shape: f32[2,2,128], index: 7, kind: output, shape index: {}]  }
   0x1   :  { %14 = vsyncpa [#allocation4 + $0x1], 0  ;;  %s1936_s24 = smov 0   ;;  %s1938_s25 = smov 0  }
   0x2   :  { %s1940_s26 = smov 0   ;;  %s1942_s27 = smov 0  }
   0x3 LB: > { %s1957_s28 = sadd.s32 4294967295, %s1874_s27   ;;  %s1571_s29 = sadd.s32 4294967294, %s1874_s27   ;;  %s1874_s27 = sphi %s1942_s27, %s2250_s27   ;;  %s1870_s26 = sphi %s1940_s26, %s2249_s26   ;;  %s1866_s25 = sphi %s1938_s25, %s2248_s25   ;;  %s1862_s24 = sphi %s1936_s24, %s2247_s24  }
   0x4   : > { %s1961_s30 = sadd.s32 1, %s1874_s27   ;;  %s179_s8 = sadd.s32 1, %s1870_s26 }
   0x5   : > { %s176_s9 = ssub.s32 %s1874_s27, %s1961_s30  ;;  %p189_p0 = scmp.ne.s32.totalorder %s1870_s26, %s1866_s25 }
   0x6   : > { %p177_p1 = scmp.eq.s32.totalorder %s176_s9, 0  ;;  %p190_p2 = scmp.eq.s32.totalorder %s1957_s28, 1 }
   0x7   : > { %p195_p3 = scmp.ne.s32.totalorder %s1866_s25, %s1862_s24  ;;  %p196_p4 = scmp.eq.s32.totalorder %s1571_s29, 1 }
   0x8   : > { %s1972_s10 = scalar_select %p177_p1, %s1870_s26, %s179_s8  }
   0x9   : > { %p1974_p5 = por %p190_p2, %p189_p0  ;;  %p1978_p6 = por %p196_p4, %p195_p3 }
   0xa   : > { %p1574_p7 = scmp.ge.s32.totalorder %s1874_s27, 1  ;;  %p242_p8 = scmp.lt.s32.totalorder %s1874_s27, 3 }
   0xc   : > { %p243_p9 = pnand %p1574_p7, %p242_p8 }
   0xd   : > { %s1576_s15 = sshll.u32 (!%p243_p9), %s1957_s28, 1  ;;  %s1879_s16 = smov (!%p243_p9), 6  }
   0xe   : > { %246 = sbr.rel (%p243_p9) target bundleno = 864 (0x360), region = 48  ;;  %p276_p10 = scmp.lt.s32.totalorder (!%p243_p9), %s1576_s15, 3 }
   0xf   : > { %s1880_s17 = smov (!%p243_p9), 64   ;;  %s1881_s18 = smov (!%p243_p9), 72  }
  0x10   : > { %s1882_s19 = smov (!%p243_p9), 80   ;;  %s1884_s21 = smov (!%p243_p9), 16  }
  0x11   : > { %s1885_s22 = smov (!%p243_p9), 88   ;;  %s1887_s29 = smov (!%p243_p9), 24  }
  0x12   : > { %s1888_s8 = smov (!%p243_p9), 48   ;;  %s1889_s9 = smov (!%p243_p9), 40  }
  0x13   : > { %v305_v0 = vld [vmem:[%s2238_s1] sm:$0xf]  ;;  %vm322_vm0 = vcmask 1043456   ;;  %v1584_v1 = vld [vmem:[%s2240_s3 + $0x4] sm:$0xf]  ;;  %s2252_s15 = smov (!%p276_p10, %s1576_s15), 3 }
  0x14   : > { %1681 = vmatprep.subr.msk.mxu0 %vm322_vm0, %v305_v0  ;;  %1753 = vmatprep.subr.msk.mxu1 %vm322_vm0, %v305_v0  ;;  %v422_v2 = vld [vmem:[%s2240_s3] sm:$0xf]  ;;  %s1755_s20 = smul.u32 24, %s2252_s15  ;;  %vm294_vm1 = vcmask 1045504   ;;  %vm313_vm2 = vcmask 31744   ;;  %vm411_vm3 = vcmask 1046528  }
  0x15   : > { %1682 = vmatpush3.msk.msra.mxu0 %vm322_vm0, %v305_v0  ;;  %1754 = vmatpush3.msk.msra.mxu1 %vm322_vm0, %v305_v0  ;;  %v1595_v23 = vld [vmem:[%s2240_s3 + $0x8] sm:$0xf]  ;;  %vm609_vm4 = vcmask 1044480   ;;  %vm762_vm5 = vcmask 25600   ;;  %v1876_v40 = vmov 0.0   ;;  %vm757_vm6 = vcmask 15360  }
  0x16   : > { %1689 = vmatprep.subr.msk.mxu1 %vm322_vm0, %v1584_v1  ;;  %1697 = vmatprep.subr.msk.mxu0 %vm322_vm0, %v422_v2  ;;  %s280_s23 = scalar_lea.vmem %s2237_s0, %s1755_s20  ;;  %763 = vst.msk [vmem:[#allocation2] sm:$0x3] %vm762_vm5, %v1876_v40  ;;  %764 = vst.msk [vmem:[#allocation2 + $0x18] sm:$0x3] %vm762_vm5, %v1876_v40  ;;  %v1602_v42 = vld [vmem:[%s2242_s5 + $0x4] sm:$0xf] }
  0x17   : > { %v282_v3 = vld [vmem:[%s280_s23] sm:$0xff]  ;;  %v283_v4 = vld [vmem:[%s280_s23 + $0x8] sm:$0xff]  ;;  %v285_v5 = vld [vmem:[%s280_s23 + $0x18] sm:$0xff]  ;;  %765 = vst.msk [vmem:[#allocation2 + $0x12] sm:$0x3] %vm762_vm5, %v1876_v40  ;;  %s1877_s20 = smov 126  }
  0x18   : > { %v295_v6 = vrot.slane %v282_v3, 2  ;;  %v296_v7 = vrot.slane %v283_v4, 2  ;;  %v286_v8 = vld [vmem:[%s280_s23 + $0x20] sm:$0xff]  ;;  %v300_v9 = vrot.slane %v285_v5, 2  ;;  %v284_v10 = vld [vmem:[%s280_s23 + $0x10] sm:$0xf] }
  0x19   : > { %v301_v11 = vrot.slane %v286_v8, 2  ;;  %v298_v12 = vrot.slane %v284_v10, 2  ;;  %v287_v13 = vld [vmem:[%s280_s23 + $0x28] sm:$0xf]  ;;  %v412_v14 = vrot.slane %v282_v3, 1  ;;  %v413_v17 = vrot.slane %v283_v4, 1 }
  0x1a   : > { %v297_v15 = vsel %vm294_vm1, %v295_v6, %v296_v7  ;;  %v303_v16 = vrot.slane %v287_v13, 2  ;;  %v415_v18 = vrot.slane %v284_v10, 1  ;;  %v417_v24 = vrot.slane %v285_v5, 1  ;;  %766 = vst.msk [vmem:[#allocation2 + $0x2a] sm:$0x3] %vm762_vm5, %v1876_v40  ;;  %s1878_s15 = smov 2  }
  0x1b   : > { %1683 = vmatprep.mubr.msk.f32.mxu0 %vm313_vm2, %v297_v15  ;;  %v302_v19 = vsel %vm294_vm1, %v300_v9, %v301_v11  ;;  %v299_v20 = vsel %vm294_vm1, %v296_v7, %v298_v12  ;;  %v414_v22 = vsel %vm411_vm3, %v412_v14, %v413_v17  ;;  %v418_v26 = vrot.slane %v286_v8, 1  ;;  %v1578_v44 = vld [vmem:[%s2239_s2] ss:$0 sm:$0xff]  ;;  %v2054_v49 = vld [vmem:[%s2242_s5 + $0x8] sm:$0xf]  ;;  %s1886_s23 = smov 32  }
  0x1c   : > { %1686 = vmatprep.mubr.msk.f32.mxu1 %vm313_vm2, %v302_v19  ;;  %1684 = vmatmul.mubr.msk.f32.vlgmr.msra.gmra.mxu0 %vm313_vm2, %v299_v20  ;;  %v304_v21 = vsel %vm294_vm1, %v301_v11, %v303_v16  ;;  %v416_v25 = vsel %vm411_vm3, %v413_v17, %v415_v18  ;;  %v420_v27 = vrot.slane %v287_v13, 1  ;;  %v610_v28 = vrot.slane %v282_v3, 3  ;;  %v775_v48 = vld [vmem:[%s2242_s5] sm:$0xf]  ;;  %v1619_v57 = vld [vmem:[%s2242_s5 + $0xc] sm:$0xf] }
  0x1d   : > { %1687 = vmatmul.mubr.msk.f32.vlgmr.msra.gmra.mxu1 %vm313_vm2, %v304_v21  ;;  %1698 = vmatpush3.msk.msra.mxu0 %vm322_vm0, %v422_v2  ;;  %v611_v29 = vrot.slane %v283_v4, 3  ;;  %v419_v30 = vsel %vm411_vm3, %v417_v24, %v418_v26  ;;  %v613_v32 = vrot.slane %v284_v10, 3  ;;  %v615_v34 = vrot.slane %v285_v5, 3  ;;  %v1601_v11 = vld [vmem:[%s2241_s4] ss:$0 sm:$0xff]  ;;  %s1890_s13 = smov 96  }
  0x1e   : > { %1690 = vmatpush3.msk.msra.mxu1 %vm322_vm0, %v1584_v1  ;;  %1691 = vmatprep.mubr.msk.f32.mxu1 %vm313_vm2, %v297_v15  ;;  %v421_v31 = vsel %vm411_vm3, %v418_v26, %v420_v27  ;;  %v616_v35 = vrot.slane %v286_v8, 3  ;;  %v618_v37 = vrot.slane %v287_v13, 3  ;;  %vm1363_vm7 = vcmask 48128   ;;  %s1891_s14 = smov 56  }
  0x1f   : > { %1699 = vmatprep.mubr.msk.f32.mxu0 %vm313_vm2, %v414_v22  ;;  %1705 = vmatprep.subr.msk.mxu1 %vm322_vm0, %v1595_v23  ;;  %v612_v33 = vsel %vm609_vm4, %v610_v28, %v611_v29  ;;  %v614_v36 = vsel %vm609_vm4, %v611_v29, %v613_v32  ;;  %vm1375_vm8 = vcmask 1041409   ;;  %vm1467_vm9 = vcmask 64512  }
  0x20   : > { %1700 = vmatmul.mubr.msk.f32.vlgmr.msra.gmra.mxu0 %vm313_vm2, %v416_v25  ;;  %v617_v38 = vsel %vm609_vm4, %v615_v34, %v616_v35  ;;  %v619_v39 = vsel %vm609_vm4, %v616_v35, %v618_v37  ;;  %1713 = vmatprep.subr.msk.mxu0 %vm322_vm0, %v1602_v42  ;;  %vm1469_vm10 = vcmask 130048   ;;  %vm1471_vm11 = vcmask 195584  }
  0x21   : > { %1692 = vmatmul.mubr.msk.f32.vlgmr.msra.gmra.mxu1 %vm313_vm2, %v299_v20  ;;  %1702 = vmatprep.mubr.msk.f32.mxu0 %vm313_vm2, %v419_v30  ;;  %vm1473_vm12 = vcmask 261120   ;;  %vm1475_vm13 = vcmask 326656   ;;  %vm1477_vm14 = vcmask 392192   ;;  %vm1479_vm15 = vcmask 457728  }
  0x22   : > { %1694 = vmatprep.mubr.msk.f32.mxu1 %vm313_vm2, %v302_v19  ;;  %1706 = vmatpush3.msk.msra.mxu1 %vm322_vm0, %v1595_v23  ;;  %vm1483_vm1 = vcmask 588800   ;;  %vm1487_vm3 = vcmask 719872   ;;  %vm1489_vm4 = vcmask 785408   ;;  %vm1491_vm5 = vcmask 850944  }
  0x23   : > { %1714 = vmatpush3.msk.msra.mxu0 %vm322_vm0, %v1602_v42  ;;  %1721 = vmatprep.subr.msk.mxu1 %vm322_vm0, %v775_v48 }
  0x24   : > { %1703 = vmatmul.mubr.msk.f32.gmra.mxu0 %vm313_vm2, %v421_v31  ;;  %1729 = vmatprep.subr.msk.mxu0 %vm322_vm0, %v2054_v49 }
  0x25   : > { %1695 = vmatmul.mubr.msk.f32.gmra.mxu1 %vm313_vm2, %v304_v21 }
  0x26   : > { %1707 = vmatprep.mubr.msk.f32.mxu1 %vm313_vm2, %v612_v33 }
  0x29   : > { %1708 = vmatmul.mubr.msk.f32.vlgmr.msra.gmra.mxu1 %vm313_vm2, %v614_v36  ;;  %v1625_v36 = vld [vmem:[%s2242_s5 + $0x10] sm:$0xf] }
  0x2a   : > { %1710 = vmatprep.mubr.msk.f32.mxu1 %vm313_vm2, %v617_v38  ;;  %1722 = vmatpush3.msk.msra.mxu1 %vm322_vm0, %v775_v48 }
  0x2b   : > { %1737 = vmatprep.subr.msk.mxu1 %vm322_vm0, %v1619_v57 }
  0x2d   : > { %1711 = vmatmul.mubr.msk.f32.gmra.mxu1 %vm313_vm2, %v619_v39 }
  0xdc   : > { %v1685_v41 = vpop.f32.mrf.mxu0 }
  0xdd   : > { %v1688_v43 = vpop.f32.mrf.mxu1  ;;  %v2061_v51 = vadd.f32 %v1685_v41, %v1578_v44 }
  0xde   : > { %v392_v45 = vpop.f32.mrf.mxu0  ;;  %v2065_v53 = vadd.f32 %v1688_v43, %v1578_v44 }
  0xdf   : > { %v2046_v46 = vadd.f32 %v1578_v44, %v392_v45  ;;  %v402_v47 = vpop.f32.mrf.mxu1  ;;  %v734_v55 = vmax.f32 %v2061_v51, 0.0 }
  0xe0   : > { %v2056_v50 = vadd.f32 %v1578_v44, %v402_v47  ;;  %v736_v56 = vmax.f32 %v2065_v53, 0.0  ;;  %v1701_v62 = vpop.f32.mrf.mxu0 }
  0xe1   : > { %v733_v52 = vmax.f32 %v2046_v46, 0.0  ;;  %v1693_v58 = vpop.f32.mrf.mxu1 }
  0xe2   : > { %v735_v54 = vmax.f32 %v2056_v50, 0.0  ;;  %v590_v63 = vpop.f32.mrf.mxu0  ;;  %v596_v9 = vadd.f32 %v1701_v62, %v1693_v58 }
  0xe3   : > { %745 = vrot.lane.b32.xlu0 %v733_v52, %s1877_s20  ;;  %v494_v59 = vpop.f32.mrf.mxu1 }
  0xe4   : > { %749 = vrot.lane.b32.xlu1 %v735_v54, %s1877_s20  ;;  %v1704_v1 = vpop.f32.mrf.mxu0  ;;  %v591_v6 = vadd.f32 %v590_v63, %v494_v59 }
  0xe5   : > { %v1696_v60 = vpop.f32.mrf.mxu1 }
  0xe6   : > { %v600_v3 = vpop.f32.mrf.mxu0  ;;  %v606_v12 = vadd.f32 %v1704_v1, %v1696_v60 }
  0xe7   : > { %747 = vrot.lane.b32.xlu0 %v734_v55, %s1877_s20  ;;  %v504_v61 = vpop.f32.mrf.mxu1 }
  0xe8   : > { %751 = vrot.lane.b32.xlu1 %v736_v56, %s1877_s20  ;;  %v601_v5 = vadd.f32 %v600_v3, %v504_v61  ;;  %s1883_s20 = smov 8  }
  0xe9   : > { %v1709_v0 = vpop.f32.mrf.mxu1 }
  0xea   : > { %v719_v14 = vadd.f32 %v1709_v0, %v596_v9 }
  0xeb   : > { %v699_v2 = vpop.f32.mrf.mxu1 }
  0xec   : > { %v718_v10 = vadd.f32 %v699_v2, %v591_v6  ;;  %v2082_v18 = vadd.f32 %v1601_v11, %v719_v14 }
  0xed   : > { %v1712_v4 = vpop.f32.mrf.mxu1 }
  0xee   : > { %v2079_v15 = vadd.f32 %v1601_v11, %v718_v10  ;;  %v721_v16 = vadd.f32 %v1712_v4, %v606_v12  ;;  %v738_v25 = vmax.f32 %v2082_v18, 0.0 }
  0xef   : > { %v709_v7 = vpop.f32.mrf.mxu1 }
  0xf0   : > { %v720_v8 = vadd.f32 %v709_v7, %v601_v5  ;;  %v737_v19 = vmax.f32 %v2079_v15, 0.0  ;;  %v2085_v20 = vadd.f32 %v1601_v11, %v721_v16 }
  0xf2   : > { %v2077_v13 = vadd.f32 %v1601_v11, %v720_v8  ;;  %v740_v26 = vmax.f32 %v2085_v20, 0.0 }
  0xf4   : > { %v739_v17 = vmax.f32 %v2077_v13, 0.0 }
 0x155   : > { %v746_v21 = vpop.permute.xlu0 %745 }
 0x156   : > { %v750_v22 = vpop.permute.xlu1 %749  ;;  %v758_v23 = vsel %vm757_vm6, %v746_v21, %v737_v19 }
 0x157   : > { %v760_v24 = vsel %vm757_vm6, %v750_v22, %v739_v17  ;;  %767 = vst.msk [vmem:[#allocation2 + $0x2] sm:$0xff] %vm313_vm2, %v758_v23  ;;  %v1631_v22 = vld [vmem:[%s2243_s6] ss:$0 sm:$0xff] }
 0x158   : > { %769 = vst.msk [vmem:[#allocation2 + $0x1a] sm:$0xff] %vm313_vm2, %v760_v24 }
 0x159   : > { %v748_v27 = vpop.permute.xlu0 %747 }
 0x15a   : > { %v752_v28 = vpop.permute.xlu1 %751  ;;  %v759_v29 = vsel %vm757_vm6, %v748_v27, %v738_v25 }
 0x15b   : > { %v761_v30 = vsel %vm757_vm6, %v752_v28, %v740_v26  ;;  %768 = vst.msk [vmem:[#allocation2 + $0xa] sm:$0xff] %vm313_vm2, %v759_v29 }
 0x15c   : > { %770 = vst.msk [vmem:[#allocation2 + $0x22] sm:$0xff] %vm313_vm2, %v761_v30 }
 0x15e   : > { %v776_v31 = vld [vmem:[#allocation2 + $0x1] sm:$0xff] }
 0x15f   : > { %v771_v32 = vld [vmem:[#allocation2] sm:$0xff]  ;;  %1715 = vmatprep.mubr.msk.f32.mxu0 %vm313_vm2, %v776_v31  ;;  %v773_v37 = vld [vmem:[#allocation2 + $0x18] sm:$0xff] }
 0x160   : > { %1723 = vmatprep.mubr.msk.f32.mxu1 %vm313_vm2, %v771_v32  ;;  %v778_v35 = vld [vmem:[#allocation2 + $0x19] sm:$0xff]  ;;  %v982_v40 = vld [vmem:[#allocation2 + $0x2] sm:$0xff] }
 0x161   : > { %v984_v44 = vld [vmem:[#allocation2 + $0x1a] sm:$0xff] }
 0x162   : > { %v777_v33 = vld [vmem:[#allocation2 + $0x9] sm:$0xff] }
 0x163   : > { %v772_v34 = vld [vmem:[#allocation2 + $0x8] sm:$0xff]  ;;  %1716 = vmatmul.mubr.msk.f32.vlgmr.msra.gmra.mxu0 %vm313_vm2, %v777_v33  ;;  %v774_v39 = vld [vmem:[#allocation2 + $0x20] sm:$0xff] }
 0x164   : > { %1724 = vmatmul.mubr.msk.f32.vlgmr.msra.gmra.mxu1 %vm313_vm2, %v772_v34  ;;  %1730 = vmatpush3.msk.msra.mxu0 %vm322_vm0, %v2054_v49  ;;  %v779_v38 = vld [vmem:[#allocation2 + $0x21] sm:$0xff]  ;;  %v983_v42 = vld [vmem:[#allocation2 + $0xa] sm:$0xff] }
 0x165   : > { %1718 = vmatprep.mubr.msk.f32.mxu0 %vm313_vm2, %v778_v35  ;;  %1726 = vmatprep.mubr.msk.f32.mxu1 %vm313_vm2, %v773_v37  ;;  %v1092_v41 = vld [vmem:[#allocation2 + $0x3] sm:$0xff]  ;;  %v1093_v43 = vld [vmem:[#allocation2 + $0xb] sm:$0xff]  ;;  %v1094_v45 = vld [vmem:[#allocation2 + $0x1b] sm:$0xff] }
 0x166   : > { %1738 = vmatpush3.msk.msra.mxu1 %vm322_vm0, %v1619_v57  ;;  %1745 = vmatprep.subr.msk.mxu0 %vm322_vm0, %v1625_v36  ;;  %v985_v47 = vld [vmem:[#allocation2 + $0x22] sm:$0xff]  ;;  %v1203_v52 = vld [vmem:[#allocation2 + $0xc] sm:$0xff] }
 0x167   : > { %1719 = vmatmul.mubr.msk.f32.gmra.mxu0 %vm313_vm2, %v779_v38  ;;  %v1095_v48 = vld [vmem:[#allocation2 + $0x23] sm:$0xff] }
 0x168   : > { %1727 = vmatmul.mubr.msk.f32.gmra.mxu1 %vm313_vm2, %v774_v39  ;;  %1731 = vmatprep.mubr.msk.f32.mxu0 %vm313_vm2, %v982_v40  ;;  %v1202_v49 = vld [vmem:[#allocation2 + $0x4] sm:$0xff]  ;;  %v1204_v54 = vld [vmem:[#allocation2 + $0x1c] sm:$0xff] }
 0x169   : > { %1739 = vmatprep.mubr.msk.f32.mxu1 %vm313_vm2, %v1092_v41  ;;  %v1205_v55 = vld [vmem:[#allocation2 + $0x24] sm:$0xff] }
 0x16b   : > { %1732 = vmatmul.mubr.msk.f32.vlgmr.msra.gmra.mxu0 %vm313_vm2, %v983_v42 }
 0x16c   : > { %1740 = vmatmul.mubr.msk.f32.vlgmr.msra.gmra.mxu1 %vm313_vm2, %v1093_v43  ;;  %1746 = vmatpush3.msk.msra.mxu0 %vm322_vm0, %v1625_v36  ;;  %vm1481_vm0 = vcmask 523264  }
 0x16d   : > { %1734 = vmatprep.mubr.msk.f32.mxu0 %vm313_vm2, %v984_v44  ;;  %1742 = vmatprep.mubr.msk.f32.mxu1 %vm313_vm2, %v1094_v45 }
 0x16f   : > { %1735 = vmatmul.mubr.msk.f32.gmra.mxu0 %vm313_vm2, %v985_v47 }
 0x170   : > { %1743 = vmatmul.mubr.msk.f32.gmra.mxu1 %vm313_vm2, %v1095_v48  ;;  %1747 = vmatprep.mubr.msk.f32.mxu0 %vm313_vm2, %v1202_v49 }
 0x173   : > { %1748 = vmatmul.mubr.msk.f32.vlgmr.msra.gmra.mxu0 %vm313_vm2, %v1203_v52 }
 0x174   : > { %1750 = vmatprep.mubr.msk.f32.mxu0 %vm313_vm2, %v1204_v54 }
 0x177   : > { %1751 = vmatmul.mubr.msk.f32.gmra.mxu0 %vm313_vm2, %v1205_v55 }
 0x223   : > { %v1717_v56 = vpop.f32.mrf.mxu0 }
 0x224   : > { %v1725_v57 = vpop.f32.mrf.mxu1 }
 0x225   : > { %v863_v58 = vpop.f32.mrf.mxu0  ;;  %v969_v24 = vadd.f32 %v1725_v57, %v1717_v56 }
 0x226   : > { %v963_v59 = vpop.f32.mrf.mxu1 }
 0x227   : > { %v1720_v60 = vpop.f32.mrf.mxu0  ;;  %v964_v3 = vadd.f32 %v963_v59, %v863_v58 }
 0x228   : > { %v1728_v61 = vpop.f32.mrf.mxu1 }
 0x229   : > { %v873_v62 = vpop.f32.mrf.mxu0  ;;  %v979_v11 = vadd.f32 %v1728_v61, %v1720_v60 }
 0x22a   : > { %v973_v63 = vpop.f32.mrf.mxu1 }
 0x22b   : > { %v1733_v0 = vpop.f32.mrf.mxu0  ;;  %v974_v8 = vadd.f32 %v973_v63, %v873_v62 }
 0x22c   : > { %v1741_v1 = vpop.f32.mrf.mxu1  ;;  %v1089_v28 = vadd.f32 %v1733_v0, %v969_v24 }
 0x22d   : > { %v1069_v2 = vpop.f32.mrf.mxu0 }
 0x22e   : > { %v1179_v4 = vpop.f32.mrf.mxu1  ;;  %v1088_v6 = vadd.f32 %v1069_v2, %v964_v3  ;;  %v1199_v33 = vadd.f32 %v1741_v1, %v1089_v28 }
 0x22f   : > { %v1736_v5 = vpop.f32.mrf.mxu0 }
 0x230   : > { %v1744_v9 = vpop.f32.mrf.mxu1  ;;  %v1198_v12 = vadd.f32 %v1179_v4, %v1088_v6  ;;  %v1091_v17 = vadd.f32 %v1736_v5, %v979_v11 }
 0x231   : > { %v1079_v7 = vpop.f32.mrf.mxu0 }
 0x232   : > { %v1090_v14 = vadd.f32 %v1079_v7, %v974_v8  ;;  %v1189_v21 = vpop.f32.mrf.mxu1  ;;  %v1201_v29 = vadd.f32 %v1744_v9, %v1091_v17 }
 0x233   : > { %v1749_v10 = vpop.f32.mrf.mxu0 }
 0x234   : > { %v1200_v25 = vadd.f32 %v1189_v21, %v1090_v14  ;;  %v1309_v34 = vadd.f32 %v1749_v10, %v1199_v33 }
 0x235   : > { %v1289_v16 = vpop.f32.mrf.mxu0 }
 0x236   : > { %v1308_v19 = vadd.f32 %v1289_v16, %v1198_v12  ;;  %v1320_v36 = vadd.f32 %v1631_v22, %v1309_v34 }
 0x237   : > { %v1752_v23 = vpop.f32.mrf.mxu0 }
 0x238   : > { %v1319_v26 = vadd.f32 %v1631_v22, %v1308_v19  ;;  %v1311_v31 = vadd.f32 %v1752_v23, %v1201_v29 }
 0x239   : > { %v1299_v27 = vpop.f32.mrf.mxu0 }
 0x23a   : > { %v1310_v30 = vadd.f32 %v1299_v27, %v1200_v25  ;;  %1327 = vrot.lane.b32.xlu0 %v1319_v26, %s1878_s15  ;;  %v1322_v35 = vadd.f32 %v1631_v22, %v1311_v31 }
 0x23c   : > { %v1321_v32 = vadd.f32 %v1631_v22, %v1310_v30 }
 0x23e   : > { %1331 = vrot.lane.b32.xlu1 %v1321_v32, %s1878_s15  ;;  %1343 = vrot.lane.b32.xlu0 %v2079_v15, %s1879_s16 }
 0x242   : > { %1347 = vrot.lane.b32.xlu1 %v2077_v13, %s1879_s16  ;;  %1333 = vrot.lane.b32.xlu0 %v1322_v35, %s1878_s15 }
 0x246   : > { %1329 = vrot.lane.b32.xlu1 %v1320_v36, %s1878_s15  ;;  %1349 = vrot.lane.b32.xlu0 %v2085_v20, %s1879_s16  ;;  %s1892_s15 = smov 112  }
 0x24a   : > { %1345 = vrot.lane.b32.xlu1 %v2082_v18, %s1879_s16  ;;  %s1893_s16 = smov 104  }
 0x2ac   : > { %v1328_v37 = vpop.permute.xlu0 %1327 }
 0x2ad   : > { %v1355_v18 = vsel %vm757_vm6, %v2046_v46, %v1328_v37 }
 0x2b0   : > { %v1332_v38 = vpop.permute.xlu1 %1331  ;;  %v1344_v39 = vpop.permute.xlu0 %1343 }
 0x2b1   : > { %v1357_v40 = vsel %vm757_vm6, %v2056_v50, %v1332_v38 }
 0x2b2   : > { %v1361_v13 = vsel %vm313_vm2, %v1357_v40, %v1332_v38 }
 0x2b4   : > { %v1348_v41 = vpop.permute.xlu1 %1347  ;;  %v1334_v42 = vpop.permute.xlu0 %1333 }
 0x2b5   : > { %v1358_v15 = vsel %vm757_vm6, %v2065_v53, %v1334_v42  ;;  %v1366_v43 = vsel %vm1363_vm7, %v1361_v13, %v1348_v41  ;;  %v1359_v53 = vsel %vm313_vm2, %v1355_v18, %v1328_v37 }
 0x2b6   : > { %v1362_v44 = vsel %vm313_vm2, %v1358_v15, %v1334_v42  ;;  %v2142_v48 = vmax.f32 %v1366_v43, 0.0  ;;  %v1364_v55 = vsel %vm1363_vm7, %v1359_v53, %v1344_v39 }
 0x2b8   : > { %v1330_v20 = vpop.permute.xlu1 %1329  ;;  %v1350_v45 = vpop.permute.xlu0 %1349  ;;  %v1374_v46 = vrot.slane %v2142_v48, 7  ;;  %v1384_v3 = vrot.slane %v2142_v48, 1  ;;  %v1396_v9 = vrot.slane %v2142_v48, 3  ;;  %v1390_v12 = vrot.slane %v2142_v48, 2 }
 0x2b9   : > { %v1356_v47 = vsel %vm757_vm6, %v2061_v51, %v1330_v20  ;;  %v1367_v50 = vsel %vm1363_vm7, %v1362_v44, %v1350_v45  ;;  %v1368_v51 = vmax.f32 %v1364_v55, 0.0  ;;  %v1408_v17 = vrot.slane %v2142_v48, 5 }
 0x2ba   : > { %v2144_v49 = vmax.f32 %v1367_v50, 0.0  ;;  %v1360_v52 = vsel %vm313_vm2, %v1356_v47, %v1330_v20  ;;  %v1402_v22 = vrot.slane %v2142_v48, 4  ;;  %v1414_v28 = vrot.slane %v2142_v48, 6 }
 0x2bb   : > { %v2160_v0 = vsel %vm1375_vm8, %v1374_v46, %v1368_v51  ;;  %v1378_v2 = vrot.slane %v1368_v51, 1  ;;  %v1383_v5 = vrot.slane %v1368_v51, 2  ;;  %v1395_v11 = vrot.slane %v1368_v51, 4 }
 0x2bc   : > { %v1346_v54 = vpop.permute.xlu1 %1345  ;;  %v1421_v58 = vrot.slane %v2144_v49, 7  ;;  %v1432_v63 = vrot.slane %v2144_v49, 1  ;;  %v1438_v8 = vrot.slane %v2144_v49, 2  ;;  %v1389_v16 = vrot.slane %v1368_v51, 3 }
 0x2bd   : > { %v1365_v56 = vsel %vm1363_vm7, %v1360_v52, %v1346_v54  ;;  %v1379_v4 = vsel %vm1375_vm8, %v2142_v48, %v1378_v2  ;;  %v1385_v7 = vsel %vm1375_vm8, %v1384_v3, %v1383_v5  ;;  %v1397_v14 = vsel %vm1375_vm8, %v1396_v9, %v1395_v11 }
 0x2be   : > { %v2148_v57 = vmax.f32 %v1365_v56, 0.0  ;;  %v1391_v19 = vsel %vm1375_vm8, %v1390_v12, %v1389_v16  ;;  %v1407_v21 = vrot.slane %v1368_v51, 6  ;;  %v1401_v24 = vrot.slane %v1368_v51, 5 }
 0x2bf   : > { %v1444_v27 = vrot.slane %v2144_v49, 3  ;;  %v1413_v30 = vrot.slane %v1368_v51, 7  ;;  %v1456_v33 = vrot.slane %v2144_v49, 5  ;;  %v1450_v36 = vrot.slane %v2144_v49, 4 }
 0x2c0   : > { %v1422_v59 = vsel %vm1375_vm8, %v1421_v58, %v2148_v57  ;;  %v1426_v60 = vrot.slane %v2148_v57, 1  ;;  %v1431_v61 = vrot.slane %v2148_v57, 2  ;;  %v1437_v6 = vrot.slane %v2148_v57, 3 }
 0x2c1   : > { %1423 = vrot.lane.b32.xlu1 %v1422_v59, %s1880_s17  ;;  %v1409_v23 = vsel %vm1375_vm8, %v1408_v17, %v1407_v21  ;;  %v1443_v25 = vrot.slane %v2148_v57, 4  ;;  %v1403_v26 = vsel %vm1375_vm8, %v1402_v22, %v1401_v24  ;;  %v1455_v31 = vrot.slane %v2148_v57, 6  ;;  %s1894_s17 = smov 120  }
 0x2c2   : > { %v1427_v62 = vsel %vm1375_vm8, %v2144_v49, %v1426_v60  ;;  %v1433_v1 = vsel %vm1375_vm8, %v1432_v63, %v1431_v61  ;;  %v1439_v10 = vsel %vm1375_vm8, %v1438_v8, %v1437_v6  ;;  %v1415_v32 = vsel %vm1375_vm8, %v1414_v28, %v1413_v30 }
 0x2c3   : > { %1428 = vrot.lane.b32.xlu0 %v1427_v62, %s1881_s18  ;;  %v1445_v29 = vsel %vm1375_vm8, %v1444_v27, %v1443_v25  ;;  %v1449_v34 = vrot.slane %v2148_v57, 5  ;;  %v1457_v35 = vsel %vm1375_vm8, %v1456_v33, %v1455_v31  ;;  %v1461_v38 = vrot.slane %v2148_v57, 7  ;;  %s272_s18 = sand.u32 1, %s1866_s25  }
 0x2c4   : > { %v1462_v39 = vrot.slane %v2144_v49, 6  ;;  %vm1485_vm2 = vcmask 654336   ;;  %vm1493_vm6 = vcmask 916480   ;;  %vm1495_vm7 = vcmask 982016  }
 0x2c5   : > { %1434 = vrot.lane.b32.xlu1 %v1433_v1, %s1882_s19  ;;  %v1451_v37 = vsel %vm1375_vm8, %v1450_v36, %v1449_v34  ;;  %s1575_s19 = sshll.u32 %s272_s18, 1 }
 0x2c6   : > { %v1463_v40 = vsel %vm1375_vm8, %v1462_v39, %v1461_v38 }
 0x2c7   : > { %1380 = vrot.lane.b32.xlu0 %v1379_v4, %s1883_s20  ;;  %s1633_s20 = sshll.u32 %s1957_s28, 5 }
 0x2c9   : > { %1386 = vrot.lane.b32.xlu1 %v1385_v7, %s1884_s21  ;;  %s274_s21 = scalar_lea.vmem [#allocation3], %s1575_s19 }
 0x2cb   : > { %1440 = vrot.lane.b32.xlu0 %v1439_v10, %s1885_s22  ;;  %s1512_s22 = sshll.u32 %s274_s21, 4  ;;  %s1513_s22 = int_to_ptr.vmem [resolvable:$true] %s1512_s22 }
 0x2cc   : > { %s1814_s28 = scalar_lea.vmem %s1513_s22, 32 }
 0x2cd   : > { %1398 = vrot.lane.b32.xlu1 %v1397_v14, %s1886_s23  ;;  %p1815_p11 = scmp.ne.s32.totalorder %s1513_s22, %s1814_s28 }
 0x2cf   : > { %1392 = vrot.lane.b32.xlu0 %v1391_v19, %s1887_s29  ;;  %p1816_p12 = pnand %p1815_p11, %p1974_p5 }
 0x2d1   : > { %1410 = vrot.lane.b32.xlu1 %v1409_v23, %s1888_s8  ;;  %s2200_s8 = scalar_lea.hbm %s2244_s7, %s1633_s20  ;;  %p1817_p13 = pneg %p1816_p12 }
 0x2d3   : > { %1404 = vrot.lane.b32.xlu0 %v1403_v26, %s1889_s9  ;;  %s1499_s9 = scalar_lea.sflag [#allocation4], %s272_s18 }
 0x2d5   : > { %1446 = vrot.lane.b32.xlu1 %v1445_v29, %s1890_s13  ;;  %s1895_s13 = smov [#allocation3]  }
 0x2d7   : > { %1416 = vrot.lane.b32.xlu0 %v1415_v32, %s1891_s14  ;;  %s1818_s14 = sshll.u32 %s1895_s13, 4  ;;  %s1819_s14 = int_to_ptr.vmem [resolvable:$false] %s1818_s14 }
 0x2d8   : > { %p1821_p0 = scmp.lt.s32.totalorder %s1513_s22, %s1819_s14 }
 0x2d9   : > { %1458 = vrot.lane.b32.xlu1 %v1457_v35, %s1892_s15  ;;  %s1820_s15 = scalar_lea.vmem %s1819_s14, 64 }
 0x2da   : > { %p1822_p1 = scmp.lt.s32.totalorder %s1820_s15, %s1814_s28 }
 0x2db   : > { %1452 = vrot.lane.b32.xlu0 %v1451_v37, %s1893_s16 }
 0x2dc   : > { %p1823_p2 = por %p1822_p1, %p1821_p0 }
 0x2de   : > { %p1824_p3 = pnand %p1823_p2, %p1817_p13 }
 0x2df   : > { %1464 = vrot.lane.b32.xlu0 %v1463_v40, %s1894_s17 }
 0x333   : > { %v1424_v41 = vpop.permute.xlu1 %1423 }
 0x335   : > { %v1429_v42 = vpop.permute.xlu0 %1428 }
 0x337   : > { %v1435_v15 = vpop.permute.xlu1 %1434 }
 0x339   : > { %v1381_v13 = vpop.permute.xlu0 %1380 }
 0x33a   : > { %v1468_v20 = vsel %vm1467_vm9, %v2160_v0, %v1381_v13 }
 0x33b   : > { %v1387_v43 = vpop.permute.xlu1 %1386 }
 0x33c   : > { %v1470_v18 = vsel %vm1469_vm10, %v1468_v20, %v1387_v43 }
 0x33d   : > { %v1441_v44 = vpop.permute.xlu0 %1440 }
 0x33f   : > { %v1399_v45 = vpop.permute.xlu1 %1398 }
 0x341   : > { %v1393_v47 = vpop.permute.xlu0 %1392 }
 0x342   : > { %v1472_v50 = vsel %vm1471_vm11, %v1470_v18, %v1393_v47 }
 0x343   : > { %v1411_v48 = vpop.permute.xlu1 %1410  ;;  %v1474_v53 = vsel %vm1473_vm12, %v1472_v50, %v1399_v45 }
 0x345   : > { %v1405_v49 = vpop.permute.xlu0 %1404 }
 0x346   : > { %v1476_v52 = vsel %vm1475_vm13, %v1474_v53, %v1405_v49 }
 0x347   : > { %v1478_v55 = vsel %vm1477_vm14, %v1476_v52, %v1411_v48  ;;  %v1447_v56 = vpop.permute.xlu1 %1446 }
 0x349   : > { %v1417_v54 = vpop.permute.xlu0 %1416 }
 0x34a   : > { %v1480_v57 = vsel %vm1479_vm15, %v1478_v55, %v1417_v54 }
 0x34b   : > { %v1482_v58 = vsel %vm1481_vm0, %v1480_v57, %v1424_v41  ;;  %v1459_v62 = vpop.permute.xlu1 %1458 }
 0x34c   : > { %v1484_v46 = vsel %vm1483_vm1, %v1482_v58, %v1429_v42 }
 0x34d   : > { %v1453_v51 = vpop.permute.xlu0 %1452  ;;  %v1486_v59 = vsel %vm1485_vm2, %v1484_v46, %v1435_v15 }
 0x34e   : > { %v1488_v60 = vsel %vm1487_vm3, %v1486_v59, %v1441_v44 }
 0x34f   : > { %v1490_v61 = vsel %vm1489_vm4, %v1488_v60, %v1447_v56 }
 0x350   : > { %v1492_v63 = vsel %vm1491_vm5, %v1490_v61, %v1453_v51 }
 0x351   : > { %v1465_v0 = vpop.permute.xlu0 %1464  ;;  %v1494_v1 = vsel %vm1493_vm6, %v1492_v63, %v1459_v62 }
 0x352   : > { %v1496_v2 = vsel %vm1495_vm7, %v1494_v1, %v1465_v0 }
 0x353   : > { %1497 = vst [vmem:[%s274_s21] sm:$0x3] %v1496_v2 }
 0x354   : > { %1827 = shalt.err (!%p1824_p3)
}
 0x355   : > { %s1828_s16 = scalar_lea.hbm %s2200_s8, 32  ;;  %s1832_s19 = scalar_lea.hbm %s2244_s7, 64 }
 0x356   : > { %p1829_p4 = scmp.ne.s32.totalorder %s2200_s8, %s1828_s16  ;;  %p1833_p9 = scmp.lt.s32.totalorder %s2200_s8, %s2244_s7 }
 0x357   : > { %p1834_p10 = scmp.lt.s32.totalorder %s1832_s19, %s1828_s16 }
 0x358   : > { %p1830_p7 = pnand %p1829_p4, %p1974_p5 }
 0x359   : > { %p1835_p11 = por %p1834_p10, %p1833_p9 }
 0x35a   : > { %p1831_p8 = pneg %p1830_p7 }
 0x35c   : > { %p1836_p12 = pnand %p1835_p11, %p1831_p8 }
 0x35e   : > { %1839 = shalt.err (!%p1836_p12)
}
 0x35f   : > { %1756 = dma.vmem_to_hbm [thread:$0]  (%p1974_p5), %s1513_s22, 32, %s2200_s8, %s1499_s9  }
 0x360 PF: > { %p1762_p13 = scmp.ge.s32.totalorder %s1874_s27, 2  ;;  %s1524_s23 = sand.u32 1, %s1862_s24  }
 0x361   : > { %s1525_s29 = scalar_lea.sflag [#allocation4], %s1524_s23 }
 0x362   : > { %p1759_p0 = pnand %p1762_p13, %p1978_p6 }
 0x364   : > { %p1760_p1 = pneg %p1759_p0 }
 0x366   : > { %1857 = dma.done.wait (%p1760_p1), %s1525_s29, 32  }
 0x367   : > { %1859 = vsyncadd (%p1760_p1), %s1525_s29, 4294967264  ;;  %p17_p2 = scmp.ge.s32.totalorder %s1961_s30, 4   ;;  %s2247_s24 = smov %s1866_s25 }
 0x368   : > { %s2248_s25 = smov %s1870_s26  ;;  %s2249_s26 = smov %s1972_s10 }
 0x369   : > { %s2250_s27 = smov %s1961_s30  ;;  %19 = sbr.rel (!%p17_p2) target bundleno = 3 (0x3), region = 89 }
 0x36e   :  { %1530 = vsyncpa [#allocation4], 1 }
 0x36f   :  { %1532 = vsyncpa [#allocation4 + $0x1], 1 }

</bundles_post_ra>
